<compile_context>
chip_gen: v7x
topology: tpu7x:2x2x1
jax: 0.10.0
libtpu: 0.0.40
codegen_flags: <defaults>
</compile_context>

<pallas_src>
import functools

import jax
import jax.numpy as jnp
from jax.experimental import pallas as pl
from jax.experimental.pallas import tpu as pltpu

LANES = 128


def _textcnn_kernel(ids_ref, wfold_ref, mask_ref, fcw_ref, fcb_ref, out_ref,
                    *, seq_len, block_p, max_fs):
    # ids_ref block: (1, Bt*S, 1) int32 token ids for this batch tile.
    N = ids_ref.shape[1]                 # Bt * S rows
    bt = N // seq_len
    V = wfold_ref.shape[0]
    lanes = wfold_ref.shape[1]           # 128

    # Embedding gather + all three convs (every filter offset) + conv biases in
    # a SINGLE MXU pass: w_fold = embedding @ w_all + bias_fold was folded in
    # the wrapper, so a one-hot row-select matmul produces every
    # (conv, offset) projection at once (vocab is tiny; see wrapper assert).
    ids = ids_ref[0]                                               # (N, 1) int32
    onehot = (jax.lax.broadcasted_iota(jnp.int32, (N, V), 1) == ids
              ).astype(jnp.float32)                                # (N, V)
    y = jnp.dot(onehot, wfold_ref[...],
                preferred_element_type=jnp.float32)                # (N, 128)

    # Combine filter offsets: sublane roll = time shift x[t] <- x[t+k]; lane
    # roll brings offset-k's lane block [k*P, k*P+3F) down to lanes [0, 3F).
    # INVARIANT (wraparound correctness): every row contaminated by the axis-0
    # wrap has local time index t >= L_i = S - fs_i + 1 for each conv i that
    # uses offset k, and vmask zeroes exactly those rows AFTER ReLU (post-ReLU
    # values are >= 0 and every conv has >= 1 valid step, so a 0/1
    # multiplicative mask preserves the max).  Do NOT reorder mask/ReLU or
    # switch to an additive -inf mask.
    acc = y                                                        # k = 0 term
    for k in range(1, max_fs):
        zk = pltpu.roll(y, shift=(N - k) % N, axis=0)
        zk = pltpu.roll(zk, shift=(lanes - k * block_p) % lanes, axis=1)
        acc = acc + zk

    conv = jnp.maximum(acc, 0.0)                                   # bias already folded
    conv = conv.reshape(bt, seq_len, lanes) * mask_ref[...][None]  # (Bt, S, 128)
    pooled = jnp.max(conv, axis=1)                                 # (Bt, 128)

    # Dropout is identity in eval mode (inference forward).
    # Lane-padded FC: junk lanes of `pooled` hit zero rows of fcw_pad.
    out_ref[...] = (jnp.dot(pooled, fcw_ref[...],
                            preferred_element_type=jnp.float32)
                    + fcb_ref[...])[None]                          # (1, Bt, 128)


def _pick_num_tiles(B, S, V):
    """Smallest T dividing B such that the per-tile activation slab fits a
    conservative scoped-VMEM budget (valid across v5e/v6e/v7x)."""
    v_pad = ((V + 127) // 128) * 128
    # per-row f32 footprint: one-hot row + ~4 (row, 128) slabs (y / rolled /
    # acc / masked conv) + the int32 id; double-buffered constants negligible.
    bytes_per_row = 4 * (v_pad + 4 * 128) + 4
    budget = 12 * 1024 * 1024            # headroom under the 16 MiB v5e default
    cap_rows = max(S, budget // bytes_per_row)
    for t in range(1, B + 1):
        if B % t == 0 and (B // t) * S <= cap_rows:
            return t
    return B


def textcnn_forward(text, params, *, filter_sizes):
    B, S = text.shape
    V, E = params["embedding"].shape
    F = params["b1"].shape[-1]
    O = params["fcb"].shape[-1]
    n_conv = len(filter_sizes)
    max_fs = max(filter_sizes)
    P = LANES // max_fs                  # per-offset lane block width
    assert S >= max_fs, "sequence must be at least the largest filter size"
    assert n_conv * F <= P, "fused conv layout needs n_conv*F <= 128 // max(filter_sizes)"
    assert O <= LANES
    # One-hot gather path is fine for tiny vocabs only.
    # TODO(synk): scalar-prefetched row gather (pl.Element on w_fold rows) for V > ~2K.
    assert V <= 2048

    f32 = jnp.float32

    # Pad the sequence to a multiple of 8 so the in-kernel reshape is a pure
    # sublane regrouping and any batch tiling keeps the (8,128) rule.
    S_pad = ((S + 7) // 8) * 8

    # ---- pack fused / lane-padded parameters (layout prep, done once) ----
    w_all = jnp.zeros((E, LANES), f32)        # (conv, offset) columns, zero padded
    bias_fold = jnp.zeros((1, LANES), f32)    # conv bias / fs_i, per used offset block
    vmask = jnp.zeros((S_pad, LANES), f32)    # 1.0 where time step < L_i for conv i
    for i, fs in enumerate(filter_sizes):
        w_i = params[f"w{i + 1}"].astype(f32)                     # (fs, E, F)
        b_i = params[f"b{i + 1}"].astype(f32).reshape(1, F)
        for k in range(fs):
            c0 = k * P + i * F
            w_all = w_all.at[:, c0:c0 + F].set(w_i[k])
            # Bias folded into the weight (one fewer input DMA + VPU add).
            # Note: out-of-range token ids lose the bias too -- they already
            # get a silent zero embedding on the one-hot path.
            bias_fold = bias_fold.at[:, c0:c0 + F].set(b_i / fs)
        L = S - fs + 1
        valid = (jnp.arange(S_pad) < L).astype(f32)[:, None]      # (S_pad, 1)
        vmask = vmask.at[:, i * F:(i + 1) * F].set(jnp.broadcast_to(valid, (S_pad, F)))

    # Fold the embedding table into the fused conv weight:
    #   onehot @ (emb @ w_all + bias) == (onehot @ emb) @ w_all + bias.
    # Halves in-kernel MXU passes, drops the (N, E) intermediate + table DMA.
    w_fold = jnp.dot(params["embedding"].astype(f32), w_all,
                     preferred_element_type=f32) + bias_fold       # (V, 128)

    fcw_pad = jnp.zeros((LANES, LANES), f32)
    fcw_pad = fcw_pad.at[:n_conv * F, :O].set(params["fcw"].astype(f32))
    fcb_pad = jnp.zeros((1, LANES), f32)
    fcb_pad = fcb_pad.at[:, :O].set(params["fcb"].astype(f32).reshape(1, O))

    # Single grid step unless VMEM forces tiling (single TC on v5e/v6e makes
    # extra tiles pure per-step overhead).
    # TODO(synk): CORE_PARALLEL / pl.core_map path to shard large batches
    # across the two v7x TensorCores.
    T = _pick_num_tiles(B, S_pad, V)
    Bt = B // T

    ids = text.astype(jnp.int32)
    if S_pad != S:
        ids = jnp.pad(ids, ((0, 0), (0, S_pad - S)))               # padded rows are masked
    ids = ids.reshape(T, Bt * S_pad, 1)

    kernel = functools.partial(_textcnn_kernel,
                               seq_len=S_pad, block_p=P, max_fs=max_fs)

    out = pl.pallas_call(
        kernel,
        out_shape=jax.ShapeDtypeStruct((T, Bt, LANES), jnp.float32),
        grid=(T,),
        in_specs=[
            pl.BlockSpec((1, Bt * S_pad, 1), lambda t: (t, 0, 0)),  # token ids (per tile)
            pl.BlockSpec((V, LANES), lambda t: (0, 0)),             # folded emb+conv+bias
            pl.BlockSpec((S_pad, LANES), lambda t: (0, 0)),         # valid-time mask
            pl.BlockSpec((LANES, LANES), lambda t: (0, 0)),         # padded FC weight
            pl.BlockSpec((1, LANES), lambda t: (0, 0)),             # padded FC bias
        ],
        out_specs=pl.BlockSpec((1, Bt, LANES), lambda t: (t, 0, 0)),
        compiler_params=pltpu.CompilerParams(
            dimension_semantics=("arbitrary",)),
    )(ids, w_fold, vmask, fcw_pad, fcb_pad)

    return out.reshape(B, LANES)[:, :O]      # lane-dense slab -> (B, O)


def ref_forward(text, params, filter_sizes):
    # Pure-JAX reference (matches PyTorch eval-mode forward).
    emb = jnp.take(params["embedding"], text, axis=0).astype(jnp.float32)  # (B, S, E)
    pools = []
    for idx, fs in enumerate(filter_sizes, 1):
        w, b = params[f"w{idx}"], params[f"b{idx}"]
        L = emb.shape[1] - fs + 1
        windows = jnp.stack([emb[:, k:k + L, :] for k in range(fs)], axis=2)  # (B,L,fs,E)
        conv = jnp.einsum("blke,kef->blf", windows, w) + b
        conv = jnp.maximum(conv, 0.0)
        pools.append(jnp.max(conv, axis=1))
    cat = jnp.concatenate(pools, axis=1)  # dropout = identity in eval
    return cat @ params["fcw"] + params["fcb"]


if __name__ == "__main__":
    vocab_size, embedding_dim = 50, 32
    n_filters, filter_sizes, output_dim = 8, (2, 3, 4), 4
    dropout_p = 0.5  # eval-mode forward -> identity
    # TODO(synk): training-mode dropout (Bernoulli mask via pltpu.prng_*) not implemented.
    B, S = 2, 16

    key = jax.random.PRNGKey(0)
    ks = jax.random.split(key, 10)
    params = {
        "embedding": 0.1 * jax.random.normal(ks[0], (vocab_size, embedding_dim), jnp.float32),
        "w1": 0.1 * jax.random.normal(ks[1], (filter_sizes[0], embedding_dim, n_filters), jnp.float32),
        "b1": 0.1 * jax.random.normal(ks[2], (1, n_filters), jnp.float32),
        "w2": 0.1 * jax.random.normal(ks[3], (filter_sizes[1], embedding_dim, n_filters), jnp.float32),
        "b2": 0.1 * jax.random.normal(ks[4], (1, n_filters), jnp.float32),
        "w3": 0.1 * jax.random.normal(ks[5], (filter_sizes[2], embedding_dim, n_filters), jnp.float32),
        "b3": 0.1 * jax.random.normal(ks[6], (1, n_filters), jnp.float32),
        "fcw": 0.1 * jax.random.normal(ks[7], (len(filter_sizes) * n_filters, output_dim), jnp.float32),
        "fcb": 0.1 * jax.random.normal(ks[8], (1, output_dim), jnp.float32),
    }
    text = jax.random.randint(ks[9], (B, S), 0, vocab_size, dtype=jnp.int32)

    out = jax.block_until_ready(textcnn_forward(text, params, filter_sizes=filter_sizes))
    ref = ref_forward(text, params, filter_sizes)
    assert out.shape == (B, output_dim)
    assert jnp.allclose(out, ref, atol=1e-4, rtol=1e-4), (out, ref)
    print("KERNEL_OK")
</pallas_src>

<mosaic_0001>
module attributes {stable_mosaic.version = 11 : i64} {
  func.func @_textcnn_kernel(%arg0: i32, %arg1: memref<1x32x1xi32, #tpu.memory_space<vmem>>, %arg2: memref<50x128xf32, #tpu.memory_space<vmem>>, %arg3: memref<16x128xf32, #tpu.memory_space<vmem>>, %arg4: memref<128x128xf32, #tpu.memory_space<vmem>>, %arg5: memref<1x128xf32, #tpu.memory_space<vmem>>, %arg6: memref<1x2x128xf32, #tpu.memory_space<vmem>>) attributes {dimension_semantics = [#tpu.dimension_semantics<arbitrary>], iteration_bounds = array<i64: 1>, scalar_prefetch = 0 : i64, scratch_operands = 0 : i64, tpu.core_type = #tpu.core_type<tc>, window_params = [{transform_indices = @transform_0, window_bounds = array<i64: 1, 32, 1>}, {pipeline_mode = #tpu.pipeline_mode<synchronous>, transform_indices = @transform_1, window_bounds = array<i64: 50, 128>}, {pipeline_mode = #tpu.pipeline_mode<synchronous>, transform_indices = @transform_2, window_bounds = array<i64: 16, 128>}, {pipeline_mode = #tpu.pipeline_mode<synchronous>, transform_indices = @transform_3, window_bounds = array<i64: 128, 128>}, {pipeline_mode = #tpu.pipeline_mode<synchronous>, transform_indices = @transform_4, window_bounds = array<i64: 1, 128>}, {transform_indices = @transform_5, window_bounds = array<i64: 1, 2, 128>}]} {
    %c0 = arith.constant 0 : index
    %c0_0 = arith.constant 0 : index
    %c0_1 = arith.constant 0 : index
    %0 = vector.load %arg1[%c0, %c0_0, %c0_1] : memref<1x32x1xi32, #tpu.memory_space<vmem>>, vector<1x32x1xi32>
    %1 = vector.shape_cast %0 : vector<1x32x1xi32> to vector<32x1xi32>
    %2 = tpu.iota {dimensions = array<i32: 1>} : vector<32x50xi32>
    %3 = vector.broadcast %1 : vector<32x1xi32> to vector<32x50xi32>
    %4 = arith.cmpi eq, %2, %3 : vector<32x50xi32>
    %5 = arith.extui %4 : vector<32x50xi1> to vector<32x50xi32>
    %6 = arith.sitofp %5 : vector<32x50xi32> to vector<32x50xf32>
    %c0_2 = arith.constant 0 : index
    %c0_3 = arith.constant 0 : index
    %7 = vector.load %arg2[%c0_2, %c0_3] : memref<50x128xf32, #tpu.memory_space<vmem>>, vector<50x128xf32>
    %cst = arith.constant dense<0.000000e+00> : vector<32x128xf32>
    %8 = tpu.matmul %6, %7, %cst {dimension_numbers = #tpu.dot_dimension_numbers<[1], [0], [0], [1], [0, 0, 1, 1], [], []>} : vector<32x50xf32>, vector<50x128xf32>, vector<32x128xf32> -> vector<32x128xf32>
    %c31_i32 = arith.constant 31 : i32
    %9 = tpu.dynamic_rotate %8 by %c31_i32 dim 0 : vector<32x128xf32>, i32 -> vector<32x128xf32>
    %c96_i32 = arith.constant 96 : i32
    %10 = tpu.dynamic_rotate %9 by %c96_i32 dim 1 : vector<32x128xf32>, i32 -> vector<32x128xf32>
    %11 = arith.addf %8, %10 : vector<32x128xf32>
    %c30_i32 = arith.constant 30 : i32
    %12 = tpu.dynamic_rotate %8 by %c30_i32 dim 0 : vector<32x128xf32>, i32 -> vector<32x128xf32>
    %c64_i32 = arith.constant 64 : i32
    %13 = tpu.dynamic_rotate %12 by %c64_i32 dim 1 : vector<32x128xf32>, i32 -> vector<32x128xf32>
    %14 = arith.addf %11, %13 : vector<32x128xf32>
    %c29_i32 = arith.constant 29 : i32
    %15 = tpu.dynamic_rotate %8 by %c29_i32 dim 0 : vector<32x128xf32>, i32 -> vector<32x128xf32>
    %c32_i32 = arith.constant 32 : i32
    %16 = tpu.dynamic_rotate %15 by %c32_i32 dim 1 : vector<32x128xf32>, i32 -> vector<32x128xf32>
    %17 = arith.addf %14, %16 : vector<32x128xf32>
    %cst_4 = arith.constant 0.000000e+00 : f32
    %18 = vector.broadcast %cst_4 : f32 to vector<32x128xf32>
    %19 = arith.maximumf %17, %18 : vector<32x128xf32>
    %20 = vector.shape_cast %19 : vector<32x128xf32> to vector<2x16x128xf32>
    %c0_5 = arith.constant 0 : index
    %c0_6 = arith.constant 0 : index
    %21 = vector.load %arg3[%c0_5, %c0_6] : memref<16x128xf32, #tpu.memory_space<vmem>>, vector<16x128xf32>
    %22 = vector.shape_cast %21 : vector<16x128xf32> to vector<1x16x128xf32>
    %23 = vector.broadcast %22 : vector<1x16x128xf32> to vector<2x16x128xf32>
    %24 = arith.mulf %20, %23 : vector<2x16x128xf32>
    %cst_7 = arith.constant dense<0xFF800000> : vector<2x128xf32>
    %25 = vector.multi_reduction <maximumf>, %24, %cst_7 [1] : vector<2x16x128xf32> to vector<2x128xf32>
    %c0_8 = arith.constant 0 : index
    %c0_9 = arith.constant 0 : index
    %26 = vector.load %arg4[%c0_8, %c0_9] : memref<128x128xf32, #tpu.memory_space<vmem>>, vector<128x128xf32>
    %cst_10 = arith.constant dense<0.000000e+00> : vector<2x128xf32>
    %27 = tpu.matmul %25, %26, %cst_10 {dimension_numbers = #tpu.dot_dimension_numbers<[1], [0], [0], [1], [0, 0, 1, 1], [], []>} : vector<2x128xf32>, vector<128x128xf32>, vector<2x128xf32> -> vector<2x128xf32>
    %c0_11 = arith.constant 0 : index
    %c0_12 = arith.constant 0 : index
    %28 = vector.load %arg5[%c0_11, %c0_12] : memref<1x128xf32, #tpu.memory_space<vmem>>, vector<1x128xf32>
    %29 = vector.broadcast %28 : vector<1x128xf32> to vector<2x128xf32>
    %30 = arith.addf %27, %29 : vector<2x128xf32>
    %31 = vector.shape_cast %30 : vector<2x128xf32> to vector<1x2x128xf32>
    %c0_13 = arith.constant 0 : index
    %c0_14 = arith.constant 0 : index
    %c0_15 = arith.constant 0 : index
    %32 = vector.load %arg6[%c0_13, %c0_14, %c0_15] : memref<1x2x128xf32, #tpu.memory_space<vmem>>, vector<1x2x128xf32>
    tpu.vector_store %arg6[%c0_13, %c0_14, %c0_15], %31 {strides = array<i32>} : memref<1x2x128xf32, #tpu.memory_space<vmem>>, vector<1x2x128xf32>,
    return
  }
  func.func @transform_0(%arg0: i32) -> (i32, i32, i32) {
    %c0_i32 = arith.constant 0 : i32
    %c0_i32_0 = arith.constant 0 : i32
    %c0_i32_1 = arith.constant 0 : i32
    return %arg0, %c0_i32, %c0_i32_0 : i32, i32, i32
  }
  func.func @transform_1(%arg0: i32) -> (i32, i32) {
    %c0_i32 = arith.constant 0 : i32
    %c0_i32_0 = arith.constant 0 : i32
    %c0_i32_1 = arith.constant 0 : i32
    return %c0_i32, %c0_i32_0 : i32, i32
  }
  func.func @transform_2(%arg0: i32) -> (i32, i32) {
    %c0_i32 = arith.constant 0 : i32
    %c0_i32_0 = arith.constant 0 : i32
    %c0_i32_1 = arith.constant 0 : i32
    return %c0_i32, %c0_i32_0 : i32, i32
  }
  func.func @transform_3(%arg0: i32) -> (i32, i32) {
    %c0_i32 = arith.constant 0 : i32
    %c0_i32_0 = arith.constant 0 : i32
    %c0_i32_1 = arith.constant 0 : i32
    return %c0_i32, %c0_i32_0 : i32, i32
  }
  func.func @transform_4(%arg0: i32) -> (i32, i32) {
    %c0_i32 = arith.constant 0 : i32
    %c0_i32_0 = arith.constant 0 : i32
    %c0_i32_1 = arith.constant 0 : i32
    return %c0_i32, %c0_i32_0 : i32, i32
  }
  func.func @transform_5(%arg0: i32) -> (i32, i32, i32) {
    %c0_i32 = arith.constant 0 : i32
    %c0_i32_0 = arith.constant 0 : i32
    %c0_i32_1 = arith.constant 0 : i32
    return %arg0, %c0_i32, %c0_i32_0 : i32, i32, i32
  }
}

</mosaic_0001>

<bundles_post_ra>
// kernel: tpu_custom_call.1
= control target key start
LH: loop header
LB: loop body
LE: loop exit
PB: predicated region body
PF: predicated region fallthrough
CT: control target
= control target key end

     0   :  { %10 = vsyncpa [#allocation3], 0  ;;  %s759_s0 = inlined_call_operand.vmem [shape: s32[1,32,1], index: 0, kind: input, shape index: {}]   ;;  %s760_s1 = inlined_call_operand.hbm [shape: f32[50,128], index: 1, kind: input, shape index: {}]   ;;  %s761_s2 = inlined_call_operand.vmem [shape: f32[16,128], index: 2, kind: input, shape index: {}]   ;;  %s762_s3 = inlined_call_operand.hbm [shape: f32[128,128], index: 3, kind: input, shape index: {}]   ;;  %s763_s4 = inlined_call_operand.vmem [shape: f32[1,128], index: 4, kind: input, shape index: {}]   ;;  %s764_s5 = inlined_call_operand.hbm [shape: f32[1,2,128], index: 5, kind: output, shape index: {}]  }
   0x1   :  { %11 = vsyncpa [#allocation6], 0 }
   0x2   :  { %12 = vsyncpa [#allocation4], 0  ;;  %s607_s18 = smov [#allocation2]   ;;  %s535_s22 = scalar_lea.hbm %s760_s1, 896 }
   0x3   :  { %s20_s19 = sshll.u32 %s607_s18, 4  ;;  %p536_p0 = scmp.ne.s32.totalorder %s760_s1, %s535_s22  ;;  %s21_s19 = int_to_ptr.vmem [resolvable:$true] %s20_s19 }
   0x4   :  { %p539_p1 = scmp.lt.u32.totalorder %s535_s22, %s760_s1 }
   0x6   :  { %p541_p2 = pnand %p539_p1, %p536_p0 }
   0x8   :  { %544 = shalt.err (!%p541_p2)
}
   0x9   :  { %s545_s27 = scalar_lea.vmem %s21_s19, 896  ;;  %p550_p4 = scmp.lt.s32.totalorder %s21_s19, %s21_s19 }
   0xa   :  { %p546_p3 = scmp.ne.s32.totalorder %s21_s19, %s545_s27  ;;  %p551_p5 = scmp.lt.s32.totalorder %s545_s27, %s545_s27 }
   0xc   :  { %p552_p6 = por %p551_p5, %p550_p4 }
   0xe   :  { %p553_p7 = pnand %p552_p6, %p546_p3 }
  0x10   :  { %556 = shalt.err (!%p553_p7)
}
  0x11   :  { %s608_s28 = smov 128   ;;  %s609_s29 = smov 8  }
  0x12   :  { %26 = dma.hbm_to_vmem [thread:$0]  %s760_s1, 896, %s21_s19, [#allocation3], %s608_s28, %s608_s28, %s609_s29  }
  0x13   :  { %s610_s7 = smov [#allocation5]   ;;  %s557_s11 = scalar_lea.hbm %s762_s3, 2048 }
  0x14   :  { %s34_s8 = sshll.u32 %s610_s7, 4  ;;  %p558_p8 = scmp.ne.s32.totalorder %s762_s3, %s557_s11  ;;  %s35_s8 = int_to_ptr.vmem [resolvable:$true] %s34_s8 }
  0x15   :  { %p561_p9 = scmp.lt.u32.totalorder %s557_s11, %s762_s3 }
  0x17   :  { %p563_p10 = pnand %p561_p9, %p558_p8 }
  0x19   :  { %566 = shalt.err (!%p563_p10)
}
  0x1a   :  { %s567_s16 = scalar_lea.vmem %s35_s8, 2048  ;;  %p572_p12 = scmp.lt.s32.totalorder %s35_s8, %s35_s8 }
  0x1b   :  { %p568_p11 = scmp.ne.s32.totalorder %s35_s8, %s567_s16  ;;  %p573_p13 = scmp.lt.s32.totalorder %s567_s16, %s567_s16 }
  0x1d   :  { %p574_p0 = por %p573_p13, %p572_p12 }
  0x1f   :  { %p575_p1 = pnand %p574_p0, %p568_p11 }
  0x21   :  { %578 = shalt.err (!%p575_p1)
}
  0x22   :  { %40 = dma.hbm_to_vmem [thread:$0]  %s762_s3, 2048, %s35_s8, [#allocation6], %s608_s28, %s608_s28, %s609_s29  }
  0x23   :  { %601 = dma.done.wait [#allocation3], 896  }
  0x24   :  { %602 = vsyncadd [#allocation3], 4294966400 }
  0x25   :  { %603 = dma.done.wait [#allocation6], 2048  }
  0x26   :  { %604 = vsyncadd [#allocation6], 4294965248  ;;  %v611_v0 = vmov 0   ;;  %v51_v1 = vld [vmem:[%s759_s0 + $0x10] sm:$0xff]  ;;  %v49_v2 = vld [vmem:[%s759_s0] sm:$0xff]  ;;  %vm99_vm0 = vcmask 1041408   ;;  %v53_v15 = vlaneseq }
  0x27   :  { %534 = vset.pattern.permute.xlu1 %v611_v0  ;;  %533 = vset.pattern.permute.xlu0 %v611_v0  ;;  %v52_v3 = vld [vmem:[%s759_s0 + $0x18] sm:$0xff]  ;;  %v79_v4 = vld [vmem:[#allocation2] sm:$0xff]  ;;  %v80_v5 = vld [vmem:[#allocation2 + $0x8] sm:$0xff]  ;;  %vm86_vm1 = vcmask 408576   ;;  %v612_v19 = vmov 0.0   ;;  %v614_v45 = vmov 0.0|0.0  }
  0x28   :  { %62 = vperm.xlu1 %534, %v51_v1   ;;  %56 = vperm.xlu0 %533, %v49_v2   ;;  %v50_v6 = vld [vmem:[%s759_s0 + $0x8] sm:$0xff]  ;;  %v485_v7 = vpack.c.bf16 %v80_v5, %v79_v4  ;;  %v81_v8 = vld [vmem:[#allocation2 + $0x10] sm:$0xff]  ;;  %v82_v9 = vld [vmem:[#allocation2 + $0x18] sm:$0xff]  ;;  %v54_v16 = vand.u32 127, %v53_v15  ;;  %v193_v26 = vshrl.u32 %v53_v15, 7  ;;  %s613_s0 = smov 96  }
  0x29   :  { %v489_v10 = vpack.c.bf16 %v82_v9, %v81_v8  ;;  %v83_v11 = vld [vmem:[#allocation2 + $0x20] sm:$0xff]  ;;  %v84_v12 = vld [vmem:[#allocation2 + $0x28] sm:$0xff]  ;;  %v85_v14 = vld [vmem:[#allocation2 + $0x30] sm:$0x3]  ;;  %497 = vmatprep.subr.bf16.mxu1 %v614_v45  ;;  %s615_s25 = smov 64   ;;  %s616_s26 = smov 32  }
  0x2a   :  { %486 = vmatprep.subr.bf16.mxu0 %v485_v7  ;;  %v493_v13 = vpack.c.bf16 %v84_v12, %v83_v11  ;;  %vm194_vm6 = vcmp.lt.s32.totalorder %v193_v26, 7  ;;  %vm215_vm7 = vcmp.lt.s32.totalorder %v193_v26, 6  ;;  %vm236_vm8 = vcmp.lt.s32.totalorder %v193_v26, 5  ;;  %v277_v35 = vld [vmem:[#allocation5] sm:$0xff]  ;;  %v278_v36 = vld [vmem:[#allocation5 + $0x8] sm:$0xff]  ;;  %v279_v53 = vld [vmem:[#allocation5 + $0x10] sm:$0xff] }
  0x2b   :  { %488 = vmatpush3.bf16.msra.mxu0 %v485_v7  ;;  %v498_v46 = vpack.c.bf16 %v278_v36, %v277_v35  ;;  %v280_v54 = vld [vmem:[#allocation5 + $0x18] sm:$0xff]  ;;  %v281_v62 = vld [vmem:[#allocation5 + $0x20] sm:$0xff]  ;;  %v282_v63 = vld [vmem:[#allocation5 + $0x28] sm:$0xff]  ;;  %vm617_vm9 = vmmov 0   ;;  %vm302_vm10 = vcmask 1041409   ;;  %s618_s7 = smov [#allocation7]  }
  0x2c   :  { %65 = vperm.xlu1 %534, %v52_v3   ;;  %59 = vperm.xlu0 %533, %v50_v6   ;;  %v501_v61 = vpack.c.bf16 %v280_v54, %v279_v53  ;;  %v504_v0 = vpack.c.bf16 %v282_v63, %v281_v62  ;;  %v283_v1 = vld [vmem:[#allocation5 + $0x30] sm:$0xff]  ;;  %v284_v2 = vld [vmem:[#allocation5 + $0x38] sm:$0xff]  ;;  %v285_v4 = vld [vmem:[#allocation5 + $0x40] sm:$0xff]  ;;  %s382_s8 = sshll.u32 %s618_s7, 4  ;;  %s383_s8 = int_to_ptr.vmem [resolvable:$true] %s382_s8 }
  0x2d   :  { %490 = vmatprep.subr.bf16.mxu0 %v489_v10  ;;  %499 = vmatpush3.bf16.msra.mxu1 %v498_v46  ;;  %v507_v3 = vpack.c.bf16 %v284_v2, %v283_v1  ;;  %v286_v5 = vld [vmem:[#allocation5 + $0x48] sm:$0xff]  ;;  %v287_v7 = vld [vmem:[#allocation5 + $0x50] sm:$0xff]  ;;  %v288_v8 = vld [vmem:[#allocation5 + $0x58] sm:$0xff]  ;;  %s579_s9 = scalar_lea.vmem %s383_s8, 32  ;;  %p584_p3 = scmp.lt.s32.totalorder %s383_s8, %s383_s8 }
  0x2e   :  { %500 = vmatprep.subr.bf16.mxu1 %v614_v45  ;;  %v510_v6 = vpack.c.bf16 %v286_v5, %v285_v4  ;;  %v513_v9 = vpack.c.bf16 %v288_v8, %v287_v7  ;;  %v290_v11 = vld [vmem:[#allocation5 + $0x68] sm:$0xff]  ;;  %482 = vmatprep.mubr.msk.f32.mxu1 %vm617_vm9, %v612_v19  ;;  %p580_p2 = scmp.ne.s32.totalorder %s383_s8, %s579_s9  ;;  %p585_p4 = scmp.lt.s32.totalorder %s579_s9, %s579_s9 }
  0x2f   :  { %492 = vmatpush3.bf16.msra.mxu0 %v489_v10  ;;  %v289_v10 = vld [vmem:[#allocation5 + $0x60] sm:$0xff]  ;;  %v401_v1 = vld [vmem:[%s763_s4] ss:$0 sm:$0xff] }
  0x30   :  { %494 = vmatprep.subr.bf16.mxu0 %v493_v13  ;;  %v516_v12 = vpack.c.bf16 %v290_v11, %v289_v10  ;;  %p586_p5 = por %p585_p4, %p584_p3 }
  0x31   :  { %502 = vmatpush3.bf16.msra.mxu1 %v501_v61 }
  0x32   :  { %503 = vmatprep.subr.bf16.mxu1 %v614_v45  ;;  %p587_p6 = pnand %p586_p5, %p580_p2 }
  0x33   :  { %496 = vmatpush3.bf16.msra.mxu0 %v493_v13  ;;  %v291_v13 = vld [vmem:[#allocation5 + $0x70] sm:$0xff] }
  0x34   :  { %442 = vmatprep.subr.msk.mxu0 %vm99_vm0, %v85_v14 }
  0x35   :  { %505 = vmatpush3.bf16.msra.mxu1 %v504_v0 }
  0x36   :  { %506 = vmatprep.subr.bf16.mxu1 %v614_v45 }
  0x37   :  { %443 = vmatpush3.msk.msra.mxu0 %vm99_vm0, %v85_v14  ;;  %v292_v14 = vld [vmem:[#allocation5 + $0x78] sm:$0xff] }
  0x38   :  { %v519_v15 = vpack.c.bf16 %v292_v14, %v291_v13 }
  0x39   :  { %508 = vmatpush3.bf16.msra.mxu1 %v507_v3 }
  0x3a   :  { %509 = vmatprep.subr.bf16.mxu1 %v614_v45 }
  0x3d   :  { %511 = vmatpush3.bf16.msra.mxu1 %v510_v6 }
  0x3e   :  { %512 = vmatprep.subr.bf16.mxu1 %v614_v45 }
  0x41   :  { %514 = vmatpush3.bf16.msra.mxu1 %v513_v9 }
  0x42   :  { %515 = vmatprep.subr.bf16.mxu1 %v614_v45 }
  0x45   :  { %517 = vmatpush3.bf16.msra.mxu1 %v516_v12 }
  0x46   :  { %518 = vmatprep.subr.bf16.mxu1 %v614_v45 }
  0x49   :  { %520 = vmatpush3.bf16.msra.mxu1 %v519_v15 }
  0xa7   :  { %v63_v17 = vpop.permute.xlu1 %62  ;;  %v57_v18 = vpop.permute.xlu0 %56 }
  0xa8   :  { %vm67_vm2 = vcmp.eq.s32.totalorder %v54_v16, %v57_v18  ;;  %vm69_vm3 = vcmp.eq.s32.totalorder %v54_v16, %v63_v17 }
  0xa9   :  { %v392_v20 = vsel %vm67_vm2, 1.0, %v612_v19  ;;  %v394_v23 = vsel %vm69_vm3, 1.0, %v612_v19 }
  0xaa   :  { %444 = vmatprep.mubr.msk.f32.mxu0 %vm86_vm1, %v392_v20 }
  0xab   :  { %v66_v21 = vpop.permute.xlu1 %65  ;;  %v60_v22 = vpop.permute.xlu0 %59 }
  0xac   :  { %vm68_vm4 = vcmp.eq.s32.totalorder %v54_v16, %v60_v22  ;;  %vm70_vm5 = vcmp.eq.s32.totalorder %v54_v16, %v66_v21 }
  0xad   :  { %v393_v24 = vsel %vm68_vm4, 1.0, %v612_v19  ;;  %v395_v25 = vsel %vm70_vm5, 1.0, %v612_v19 }
  0xae   :  { %445 = vmatmul.mubr.msk.f32.vlgmr.msra.gmra.mrb[0].mxu0 %vm86_vm1, %v393_v24 }
  0xaf   :  { %447 = vmatprep.mubr.msk.f32.mxu0 %vm86_vm1, %v394_v23 }
  0xb2   :  { %448 = vmatmul.mubr.msk.f32.gmra.mrb[2].mxu0 %vm86_vm1, %v395_v25 }
 0x181   :  { %v689_v27 = vpop.f32.mrb[0].mxu0 }
 0x182   :  { %v189_v28 = vrot.slane %v689_v27, 1  ;;  %v212_v29 = vrot.slane %v689_v27, 2  ;;  %v233_v30 = vrot.slane %v689_v27, 3  ;;  %v694_v31 = vpop.f32.mrb[1].mxu0 }
 0x183   :  { %v188_v32 = vrot.slane %v694_v31, 1  ;;  %v211_v33 = vrot.slane %v694_v31, 2  ;;  %v232_v34 = vrot.slane %v694_v31, 3 }
 0x185   :  { %v699_v37 = vpop.f32.mrb[2].mxu0  ;;  %v197_v38 = vsel %vm194_vm6, %v188_v32, %v189_v28  ;;  %v218_v39 = vsel %vm215_vm7, %v211_v33, %v212_v29  ;;  %v239_v40 = vsel %vm236_vm8, %v232_v34, %v233_v30 }
 0x186   :  { %v191_v41 = vrot.slane %v699_v37, 1  ;;  %v214_v42 = vrot.slane %v699_v37, 2  ;;  %v235_v43 = vrot.slane %v699_v37, 3  ;;  %199 = vrot.lane.b32.xlu0 %v197_v38, %s613_s0  ;;  %v708_v44 = vpop.f32.mrb[3].mxu0 }
 0x187   :  { %v190_v47 = vrot.slane %v708_v44, 1  ;;  %v213_v48 = vrot.slane %v708_v44, 2  ;;  %v234_v49 = vrot.slane %v708_v44, 3 }
 0x188   :  { %v198_v50 = vsel %vm194_vm6, %v191_v41, %v188_v32  ;;  %v219_v51 = vsel %vm215_vm7, %v214_v42, %v211_v33  ;;  %v240_v52 = vsel %vm236_vm8, %v235_v43, %v232_v34 }
 0x189   :  { %205 = vrot.lane.b32.xlu1 %v198_v50, %s613_s0  ;;  %v196_v55 = vsel %vm194_vm6, %v189_v28, %v190_v47  ;;  %v195_v56 = vsel %vm194_vm6, %v190_v47, %v191_v41  ;;  %v217_v57 = vsel %vm215_vm7, %v212_v29, %v213_v48  ;;  %v216_v58 = vsel %vm215_vm7, %v213_v48, %v214_v42 }
 0x18a   :  { %220 = vrot.lane.b32.xlu0 %v218_v39, %s615_s25  ;;  %v238_v59 = vsel %vm236_vm8, %v233_v30, %v234_v49  ;;  %v237_v60 = vsel %vm236_vm8, %v234_v49, %v235_v43 }
 0x18d   :  { %226 = vrot.lane.b32.xlu1 %v219_v51, %s615_s25 }
 0x18e   :  { %241 = vrot.lane.b32.xlu0 %v239_v40, %s616_s26  ;;  %v258_v40 = vld [vmem:[%s761_s2 + $0x8] sm:$0xff] }
 0x191   :  { %201 = vrot.lane.b32.xlu1 %v196_v55, %s613_s0 }
 0x192   :  { %203 = vrot.lane.b32.xlu0 %v195_v56, %s613_s0 }
 0x195   :  { %222 = vrot.lane.b32.xlu1 %v217_v57, %s615_s25 }
 0x196   :  { %224 = vrot.lane.b32.xlu0 %v216_v58, %s615_s25 }
 0x199   :  { %243 = vrot.lane.b32.xlu1 %v238_v59, %s616_s26 }
 0x19a   :  { %245 = vrot.lane.b32.xlu0 %v237_v60, %s616_s26 }
 0x19d   :  { %247 = vrot.lane.b32.xlu1 %v240_v52, %s616_s26 }
 0x1f8   :  { %v200_v16 = vpop.permute.xlu0 %199 }
 0x1f9   :  { %v207_v23 = vadd.f32 %v200_v16, %v694_v31  ;;  %v257_v31 = vld [vmem:[%s761_s2] sm:$0xff] }
 0x1fb   :  { %v206_v17 = vpop.permute.xlu1 %205 }
 0x1fc   :  { %v221_v18 = vpop.permute.xlu0 %220  ;;  %v210_v35 = vadd.f32 %v699_v37, %v206_v17 }
 0x1fd   :  { %v228_v25 = vadd.f32 %v221_v18, %v207_v23 }
 0x1ff   :  { %v227_v20 = vpop.permute.xlu1 %226 }
 0x200   :  { %v242_v21 = vpop.permute.xlu0 %241  ;;  %v231_v41 = vadd.f32 %v227_v20, %v210_v35 }
 0x201   :  { %v249_v28 = vadd.f32 %v242_v21, %v228_v25 }
 0x203   :  { %v202_v22 = vpop.permute.xlu1 %201  ;;  %v253_v36 = vmax.f32 %v249_v28, 0.0 }
 0x204   :  { %v204_v24 = vpop.permute.xlu0 %203  ;;  %v208_v29 = vadd.f32 %v689_v27, %v202_v22 }
 0x205   :  { %v209_v30 = vadd.f32 %v204_v24, %v708_v44  ;;  %v259_v44 = vmul.f32 %v257_v31, %v253_v36 }
 0x207   :  { %v223_v26 = vpop.permute.xlu1 %222 }
 0x208   :  { %v225_v19 = vpop.permute.xlu0 %224  ;;  %v229_v32 = vadd.f32 %v223_v26, %v208_v29 }
 0x209   :  { %v230_v33 = vadd.f32 %v225_v19, %v209_v30 }
 0x20b   :  { %v244_v34 = vpop.permute.xlu1 %243 }
 0x20c   :  { %v250_v38 = vadd.f32 %v244_v34, %v229_v32  ;;  %v246_v39 = vpop.permute.xlu0 %245 }
 0x20d   :  { %v251_v27 = vadd.f32 %v246_v39, %v230_v33 }
 0x20e   :  { %v254_v42 = vmax.f32 %v250_v38, 0.0 }
 0x20f   :  { %v248_v43 = vpop.permute.xlu1 %247  ;;  %v255_v46 = vmax.f32 %v251_v27, 0.0 }
 0x210   :  { %v260_v45 = vmul.f32 %v258_v40, %v254_v42  ;;  %v252_v47 = vadd.f32 %v248_v43, %v231_v41 }
 0x211   :  { %v261_v50 = vmul.f32 %v257_v31, %v255_v46 }
 0x212   :  { %v263_v37 = vmax.f32 %v259_v44, %v260_v45  ;;  %v256_v48 = vmax.f32 %v252_v47, 0.0 }
 0x214   :  { %v264_v49 = vrot.slane %v263_v37, 4  ;;  %v262_v51 = vmul.f32 %v258_v40, %v256_v48 }
 0x216   :  { %v265_v52 = vmax.f32 %v263_v37, %v264_v49  ;;  %v270_v53 = vmax.f32 %v261_v50, %v262_v51 }
 0x218   :  { %v266_v54 = vrot.slane %v265_v52, 2  ;;  %v271_v55 = vrot.slane %v270_v53, 4 }
 0x21a   :  { %v272_v56 = vmax.f32 %v270_v53, %v271_v55  ;;  %v267_v57 = vmax.f32 %v265_v52, %v266_v54 }
 0x21c   :  { %v273_v58 = vrot.slane %v272_v56, 2  ;;  %v268_v59 = vrot.slane %v267_v57, 1 }
 0x21e   :  { %v274_v60 = vmax.f32 %v272_v56, %v273_v58  ;;  %v269_v62 = vmax.f32 %v267_v57, %v268_v59 }
 0x220   :  { %v275_v61 = vrot.slane %v274_v60, 1 }
 0x222   :  { %v276_v63 = vmax.f32 %v274_v60, %v275_v61 }
 0x224   :  { %v303_v0 = vsel %vm302_vm10, %v276_v63, %v269_v62 }
 0x225   :  { %483 = vmatmul.mubr.f32.vlgmr.msra.gmra.mrb[0].mxu1 %v303_v0 }
 0x2f8   :  { %v371_v2 = vpop.f32.mrb[0].mxu1 }
 0x2f9   :  { %v372_v3 = vadd.f32 %v401_v1, %v371_v2  ;;  %v484_v4 = vpop.f32.mrb[1].mxu1 }
 0x2fb   :  { %375 = vst [vmem:[#allocation7] sm:$0x3] %v372_v3 }
 0x2fc   :  { %590 = shalt.err (!%p587_p6)
}
 0x2fd   :  { %s591_s12 = scalar_lea.hbm %s764_s5, 32 }
 0x2fe   :  { %p592_p7 = scmp.ne.s32.totalorder %s764_s5, %s591_s12  ;;  %p595_p8 = scmp.lt.u32.totalorder %s591_s12, %s764_s5 }
 0x300   :  { %p597_p9 = pnand %p595_p8, %p592_p7 }
 0x302   :  { %600 = shalt.err (!%p597_p9)
}
 0x303   :  { %385 = dma.vmem_to_hbm [thread:$0]  %s383_s8, 32, %s764_s5, [#allocation4]  }
 0x304   :  { %605 = dma.done.wait [#allocation4], 32  }
 0x305   :  { %606 = vsyncadd [#allocation4], 4294967264 }
 0x306   :  { %389 = vsyncpa [#allocation3], 1 }
 0x307   :  { %390 = vsyncpa [#allocation6], 1 }
 0x308   :  { %391 = vsyncpa [#allocation4], 1 }

</bundles_post_ra>
